<compile_context>
chip_gen: v6e
topology: v6e:2x2x1
jax: 0.10.0
libtpu: 0.0.40
codegen_flags: <defaults>
</compile_context>

<pallas_src>
import numpy as np
import jax
import jax.numpy as jnp
from jax.experimental import pallas as pl
from jax.experimental.pallas import tpu as pltpu

LANE = 128  # TPU vreg lane width


def _round_up(x, m):
    return ((x + m - 1) // m) * m


def _cdiv(a, b):
    return -(-a // b)


def _mlp_kernel(x_ref, w1_ref, b1_ref, w2_ref, b2_ref, w3_ref, b3_ref, out_ref):
    # Fused Linear -> ReLU -> Linear -> ReLU -> Linear on one batch tile.
    # x arrives already in bf16 (cast once in the wrapper); MXU matmuls
    # accumulate in f32; bias-add and ReLU stay in f32.
    x = x_ref[...]
    h = jnp.dot(x, w1_ref[...], preferred_element_type=jnp.float32) + b1_ref[...]
    h = jnp.maximum(h, 0.0)
    h = jnp.dot(h.astype(jnp.bfloat16), w2_ref[...],
                preferred_element_type=jnp.float32) + b2_ref[...]
    h = jnp.maximum(h, 0.0)
    out = jnp.dot(h.astype(jnp.bfloat16), w3_ref[...],
                  preferred_element_type=jnp.float32) + b3_ref[...]
    out_ref[...] = out.astype(out_ref.dtype)


def init_mlp_params(key, input_dim, num_hidden, out_dim):
    """Deterministic synthetic parameters (same shapes as the nn.Linear layers),
    stored pre-transposed as (in_features, out_features)."""
    dims = [input_dim, num_hidden[0], num_hidden[1], out_dim]
    params = {}
    for i in range(3):
        key, kw, kb = jax.random.split(key, 3)
        fan_in, fan_out = dims[i], dims[i + 1]
        bound = 1.0 / np.sqrt(fan_in)
        params[f"w{i+1}"] = jax.random.uniform(
            kw, (fan_in, fan_out), jnp.float32, minval=-bound, maxval=bound)
        params[f"b{i+1}"] = jax.random.uniform(
            kb, (1, fan_out), jnp.float32, minval=-bound, maxval=bound)
    return params


def prepare_params(params, matmul_dtype=jnp.bfloat16):
    """Zero-pad hidden/output feature dims up to multiples of 128 (lane-dense,
    MXU-aligned) and cast weights to the matmul operand dtype. Padding is
    mathematically inert (zero rows/cols, zero biases); the wrapper slices the
    padded output columns off. Call once, reuse across forward calls."""
    # TODO(synk): for non-toy hidden sizes on v6e/v7x, pad contraction dims to 256
    # (2x256^2 MXU); at the shipped 32/16/8 dims the extra padding only costs DMA.
    w1, b1 = params["w1"], params["b1"]
    w2, b2 = params["w2"], params["b2"]
    w3, b3 = params["w3"], params["b3"]
    in_dim, h0 = w1.shape
    _, h1 = w2.shape
    _, out_dim = w3.shape
    h0p, h1p, outp = (_round_up(d, LANE) for d in (h0, h1, out_dim))

    def pad2(a, rows, cols):
        return jnp.pad(a, ((0, rows - a.shape[0]), (0, cols - a.shape[1])))

    prepped = {
        "w1": pad2(w1, in_dim, h0p).astype(matmul_dtype),
        "b1": pad2(b1, 1, h0p).astype(jnp.float32),
        "w2": pad2(w2, h0p, h1p).astype(matmul_dtype),
        "b2": pad2(b2, 1, h1p).astype(jnp.float32),
        "w3": pad2(w3, h1p, outp).astype(matmul_dtype),
        "b3": pad2(b3, 1, outp).astype(jnp.float32),
    }
    return prepped, out_dim


def mlp_forward(obs, pparams, out_dim, *, tb_max=512, vmem_budget_bytes=24 << 20):
    """obs: any shape (B, ...). pparams: output of prepare_params.
    Returns (B, out_dim) float32 embedding."""
    obs = jnp.asarray(obs, dtype=jnp.float32)
    B = obs.shape[0]
    # torch .flatten(1); stream x in bf16 (halves DMA bytes of the dominant
    # streamed operand); matmul accumulates in f32 in the kernel.
    x = obs.reshape(B, -1).astype(jnp.bfloat16)
    in_dim = x.shape[1]

    w1, b1 = pparams["w1"], pparams["b1"]
    w2, b2 = pparams["w2"], pparams["b2"]
    w3, b3 = pparams["w3"], pparams["b3"]
    h0p, h1p, out_p = w1.shape[1], w2.shape[1], w3.shape[1]

    weight_bytes = sum(int(np.prod(a.shape)) * a.dtype.itemsize
                       for a in (w1, b1, w2, b2, w3, b3))

    # Per-batch-row VMEM footprint: double-buffered bf16 x tile, double-buffered
    # f32 out tile, f32 + bf16 copies of the hidden activations.
    per_row_bytes = 2 * in_dim * 2 + 2 * out_p * 4 + (h0p + h1p) * 6
    tb_cap = (vmem_budget_bytes - weight_bytes) // max(per_row_bytes, 1)
    tb_cap = max(8, (tb_cap // 8) * 8)
    tb_max_eff = max(8, min(tb_max, tb_cap))

    # Choose TB to (a) minimize batch padding and (b) give >=2 grid steps when the
    # batch allows it, so the "parallel" axis can split across both v7x TensorCores
    # (neutral on single-TC v5e/v6e). Per-grid-step overhead ~0.35 us -> TB stays big.
    min_tiles = 2 if B >= 16 else 1
    n_tiles = max(_cdiv(B, tb_max_eff), min_tiles)
    TB = _round_up(_cdiv(B, n_tiles), 8)
    Bp = _round_up(B, TB)
    if Bp != B:
        x = jnp.pad(x, ((0, Bp - B), (0, 0)))
    grid = (Bp // TB,)

    flops = 2 * Bp * (in_dim * h0p + h0p * h1p + h1p * out_p)
    bytes_accessed = x.size * x.dtype.itemsize + Bp * out_p * 4 + weight_bytes

    # Explicit scoped-VMEM limit: weights (single buffer) + streamed tiles +
    # intermediates, with headroom; floored at the universal 16 MiB default and
    # capped well under v7x's 64 MiB physical per-TC VMEM.
    vmem_needed = weight_bytes + TB * per_row_bytes
    vmem_limit = int(min(max(2 * vmem_needed, 16 << 20), 48 << 20))

    const2 = lambda i: (0, 0)            # weights/biases: block index never changes
    resident = pl.Buffered(1)            # -> single VMEM buffer, DMA'd once

    out_padded = pl.pallas_call(
        _mlp_kernel,
        out_shape=jax.ShapeDtypeStruct((Bp, out_p), jnp.float32),
        grid=grid,
        in_specs=[
            pl.BlockSpec((TB, in_dim), lambda i: (i, 0)),   # streamed batch tiles
            pl.BlockSpec(w1.shape, const2, pipeline_mode=resident),
            pl.BlockSpec(b1.shape, const2, pipeline_mode=resident),
            pl.BlockSpec(w2.shape, const2, pipeline_mode=resident),
            pl.BlockSpec(b2.shape, const2, pipeline_mode=resident),
            pl.BlockSpec(w3.shape, const2, pipeline_mode=resident),
            pl.BlockSpec(b3.shape, const2, pipeline_mode=resident),
        ],
        out_specs=pl.BlockSpec((TB, out_p), lambda i: (i, 0)),
        compiler_params=pltpu.CompilerParams(
            dimension_semantics=("parallel",),
            vmem_limit_bytes=vmem_limit),
        cost_estimate=pl.CostEstimate(
            flops=flops, transcendentals=0, bytes_accessed=bytes_accessed),
    )(x, w1, b1, w2, b2, w3, b3)

    return out_padded[:B, :out_dim]


if __name__ == "__main__":
    # Small shapes consistent with the module's forward:
    #   env_state_shape = (4, 16)  -> input_dim = 64
    #   sourceenv_state_shape = (8,) -> out_dim = 8
    #   num_hidden = [32, 16]
    batch = 2
    env_state_shape = (4, 16)
    sourceenv_state_shape = (8,)
    num_hidden = [32, 16]

    input_dim = int(np.prod(env_state_shape))
    out_dim = int(np.prod(sourceenv_state_shape))

    key = jax.random.PRNGKey(0)
    key_obs, key_params = jax.random.split(key)

    obs = jax.random.normal(key_obs, (batch,) + env_state_shape, dtype=jnp.float32)
    params = init_mlp_params(key_params, input_dim, num_hidden, out_dim)
    pparams, logical_out_dim = prepare_params(params)

    # Pallas kernel result
    emb = mlp_forward(obs, pparams, logical_out_dim)
    emb = jax.block_until_ready(emb)
    assert emb.shape == (batch, out_dim)

    # Reference with identical operand dtypes (bf16 matmul operands, f32 accum).
    x = obs.reshape(batch, -1)

    def ref_layer(xx, w, b, relu):
        y = jnp.dot(xx.astype(jnp.bfloat16), w.astype(jnp.bfloat16),
                    preferred_element_type=jnp.float32) + b
        return jnp.maximum(y, 0.0) if relu else y

    h = ref_layer(x, params["w1"], params["b1"], True)
    h = ref_layer(h, params["w2"], params["b2"], True)
    ref_bf16 = ref_layer(h, params["w3"], params["b3"], False)
    np.testing.assert_allclose(np.asarray(emb), np.asarray(ref_bf16),
                               rtol=1e-4, atol=1e-4)

    # Loose sanity check against the exact f32 torch semantics.
    hf = jnp.maximum(x @ params["w1"] + params["b1"], 0.0)
    hf = jnp.maximum(hf @ params["w2"] + params["b2"], 0.0)
    ref_f32 = hf @ params["w3"] + params["b3"]
    np.testing.assert_allclose(np.asarray(emb), np.asarray(ref_f32),
                               rtol=1e-1, atol=1e-1)

    print("KERNEL_OK")
</pallas_src>

<mosaic_0001>
module attributes {stable_mosaic.version = 11 : i64} {
  func.func @_mlp_kernel(%arg0: i32, %arg1: memref<8x64xbf16, #tpu.memory_space<vmem>>, %arg2: memref<64x128xbf16, #tpu.memory_space<vmem>>, %arg3: memref<1x128xf32, #tpu.memory_space<vmem>>, %arg4: memref<128x128xbf16, #tpu.memory_space<vmem>>, %arg5: memref<1x128xf32, #tpu.memory_space<vmem>>, %arg6: memref<128x128xbf16, #tpu.memory_space<vmem>>, %arg7: memref<1x128xf32, #tpu.memory_space<vmem>>, %arg8: memref<8x128xf32, #tpu.memory_space<vmem>>) attributes {dimension_semantics = [#tpu.dimension_semantics<parallel>], iteration_bounds = array<i64: 1>, scalar_prefetch = 0 : i64, scratch_operands = 0 : i64, tpu.core_type = #tpu.core_type<tc>, window_params = [{transform_indices = @transform_0, window_bounds = array<i64: 8, 64>}, {pipeline_mode = #tpu.pipeline_mode<synchronous>, transform_indices = @transform_1, window_bounds = array<i64: 64, 128>}, {pipeline_mode = #tpu.pipeline_mode<synchronous>, transform_indices = @transform_2, window_bounds = array<i64: 1, 128>}, {pipeline_mode = #tpu.pipeline_mode<synchronous>, transform_indices = @transform_3, window_bounds = array<i64: 128, 128>}, {pipeline_mode = #tpu.pipeline_mode<synchronous>, transform_indices = @transform_4, window_bounds = array<i64: 1, 128>}, {pipeline_mode = #tpu.pipeline_mode<synchronous>, transform_indices = @transform_5, window_bounds = array<i64: 128, 128>}, {pipeline_mode = #tpu.pipeline_mode<synchronous>, transform_indices = @transform_6, window_bounds = array<i64: 1, 128>}, {transform_indices = @transform_7, window_bounds = array<i64: 8, 128>}]} {
    %c0 = arith.constant 0 : index
    %c0_0 = arith.constant 0 : index
    %0 = vector.load %arg1[%c0, %c0_0] : memref<8x64xbf16, #tpu.memory_space<vmem>>, vector<8x64xbf16>
    %c0_1 = arith.constant 0 : index
    %c0_2 = arith.constant 0 : index
    %1 = vector.load %arg2[%c0_1, %c0_2] : memref<64x128xbf16, #tpu.memory_space<vmem>>, vector<64x128xbf16>
    %cst = arith.constant dense<0.000000e+00> : vector<8x128xf32>
    %2 = tpu.matmul %0, %1, %cst {dimension_numbers = #tpu.dot_dimension_numbers<[1], [0], [0], [1], [0, 0, 1, 1], [], []>} : vector<8x64xbf16>, vector<64x128xbf16>, vector<8x128xf32> -> vector<8x128xf32>
    %c0_3 = arith.constant 0 : index
    %c0_4 = arith.constant 0 : index
    %3 = vector.load %arg3[%c0_3, %c0_4] : memref<1x128xf32, #tpu.memory_space<vmem>>, vector<1x128xf32>
    %4 = vector.broadcast %3 : vector<1x128xf32> to vector<8x128xf32>
    %5 = arith.addf %2, %4 : vector<8x128xf32>
    %cst_5 = arith.constant 0.000000e+00 : f32
    %6 = vector.broadcast %cst_5 : f32 to vector<8x128xf32>
    %7 = arith.maximumf %5, %6 : vector<8x128xf32>
    %8 = arith.truncf %7 : vector<8x128xf32> to vector<8x128xbf16>
    %c0_6 = arith.constant 0 : index
    %c0_7 = arith.constant 0 : index
    %9 = vector.load %arg4[%c0_6, %c0_7] : memref<128x128xbf16, #tpu.memory_space<vmem>>, vector<128x128xbf16>
    %cst_8 = arith.constant dense<0.000000e+00> : vector<8x128xf32>
    %10 = tpu.matmul %8, %9, %cst_8 {dimension_numbers = #tpu.dot_dimension_numbers<[1], [0], [0], [1], [0, 0, 1, 1], [], []>} : vector<8x128xbf16>, vector<128x128xbf16>, vector<8x128xf32> -> vector<8x128xf32>
    %c0_9 = arith.constant 0 : index
    %c0_10 = arith.constant 0 : index
    %11 = vector.load %arg5[%c0_9, %c0_10] : memref<1x128xf32, #tpu.memory_space<vmem>>, vector<1x128xf32>
    %12 = vector.broadcast %11 : vector<1x128xf32> to vector<8x128xf32>
    %13 = arith.addf %10, %12 : vector<8x128xf32>
    %cst_11 = arith.constant 0.000000e+00 : f32
    %14 = vector.broadcast %cst_11 : f32 to vector<8x128xf32>
    %15 = arith.maximumf %13, %14 : vector<8x128xf32>
    %16 = arith.truncf %15 : vector<8x128xf32> to vector<8x128xbf16>
    %c0_12 = arith.constant 0 : index
    %c0_13 = arith.constant 0 : index
    %17 = vector.load %arg6[%c0_12, %c0_13] : memref<128x128xbf16, #tpu.memory_space<vmem>>, vector<128x128xbf16>
    %cst_14 = arith.constant dense<0.000000e+00> : vector<8x128xf32>
    %18 = tpu.matmul %16, %17, %cst_14 {dimension_numbers = #tpu.dot_dimension_numbers<[1], [0], [0], [1], [0, 0, 1, 1], [], []>} : vector<8x128xbf16>, vector<128x128xbf16>, vector<8x128xf32> -> vector<8x128xf32>
    %c0_15 = arith.constant 0 : index
    %c0_16 = arith.constant 0 : index
    %19 = vector.load %arg7[%c0_15, %c0_16] : memref<1x128xf32, #tpu.memory_space<vmem>>, vector<1x128xf32>
    %20 = vector.broadcast %19 : vector<1x128xf32> to vector<8x128xf32>
    %21 = arith.addf %18, %20 : vector<8x128xf32>
    %c0_17 = arith.constant 0 : index
    %c0_18 = arith.constant 0 : index
    %22 = vector.load %arg8[%c0_17, %c0_18] : memref<8x128xf32, #tpu.memory_space<vmem>>, vector<8x128xf32>
    tpu.vector_store %arg8[%c0_17, %c0_18], %21 {strides = array<i32>} : memref<8x128xf32, #tpu.memory_space<vmem>>, vector<8x128xf32>,
    return
  }
  func.func @transform_0(%arg0: i32) -> (i32, i32) {
    %c0_i32 = arith.constant 0 : i32
    %c0_i32_0 = arith.constant 0 : i32
    return %arg0, %c0_i32 : i32, i32
  }
  func.func @transform_1(%arg0: i32) -> (i32, i32) {
    %c0_i32 = arith.constant 0 : i32
    %c0_i32_0 = arith.constant 0 : i32
    %c0_i32_1 = arith.constant 0 : i32
    return %c0_i32, %c0_i32_0 : i32, i32
  }
  func.func @transform_2(%arg0: i32) -> (i32, i32) {
    %c0_i32 = arith.constant 0 : i32
    %c0_i32_0 = arith.constant 0 : i32
    %c0_i32_1 = arith.constant 0 : i32
    return %c0_i32, %c0_i32_0 : i32, i32
  }
  func.func @transform_3(%arg0: i32) -> (i32, i32) {
    %c0_i32 = arith.constant 0 : i32
    %c0_i32_0 = arith.constant 0 : i32
    %c0_i32_1 = arith.constant 0 : i32
    return %c0_i32, %c0_i32_0 : i32, i32
  }
  func.func @transform_4(%arg0: i32) -> (i32, i32) {
    %c0_i32 = arith.constant 0 : i32
    %c0_i32_0 = arith.constant 0 : i32
    %c0_i32_1 = arith.constant 0 : i32
    return %c0_i32, %c0_i32_0 : i32, i32
  }
  func.func @transform_5(%arg0: i32) -> (i32, i32) {
    %c0_i32 = arith.constant 0 : i32
    %c0_i32_0 = arith.constant 0 : i32
    %c0_i32_1 = arith.constant 0 : i32
    return %c0_i32, %c0_i32_0 : i32, i32
  }
  func.func @transform_6(%arg0: i32) -> (i32, i32) {
    %c0_i32 = arith.constant 0 : i32
    %c0_i32_0 = arith.constant 0 : i32
    %c0_i32_1 = arith.constant 0 : i32
    return %c0_i32, %c0_i32_0 : i32, i32
  }
  func.func @transform_7(%arg0: i32) -> (i32, i32) {
    %c0_i32 = arith.constant 0 : i32
    %c0_i32_0 = arith.constant 0 : i32
    return %arg0, %c0_i32 : i32, i32
  }
}

</mosaic_0001>

<bundles_post_ra>
// kernel: tpu_custom_call.1
= control target key start
LH: loop header
LB: loop body
LE: loop exit
PB: predicated region body
PF: predicated region fallthrough
CT: control target
= control target key end

     0   :  { %12 = vsyncpa [#allocation3], 0  ;;  %s753_s0 = inlined_call_operand.hbm [shape: bf16[8,64], index: 0, kind: input, shape index: {}]   ;;  %s754_s1 = inlined_call_operand.hbm [shape: bf16[64,128], index: 1, kind: input, shape index: {}]   ;;  %s755_s2 = inlined_call_operand.vmem [shape: f32[1,128], index: 2, kind: input, shape index: {}]   ;;  %s756_s3 = inlined_call_operand.hbm [shape: bf16[128,128], index: 3, kind: input, shape index: {}]   ;;  %s757_s4 = inlined_call_operand.vmem [shape: f32[1,128], index: 4, kind: input, shape index: {}]   ;;  %s758_s5 = inlined_call_operand.hbm [shape: bf16[128,128], index: 5, kind: input, shape index: {}]   ;;  %s759_s6 = inlined_call_operand.vmem [shape: f32[1,128], index: 6, kind: input, shape index: {}]   ;;  %s760_s7 = inlined_call_operand.hbm [shape: f32[8,128], index: 7, kind: output, shape index: {}]  }
   0x1   :  { %13 = vsyncpa [#allocation6], 0 }
   0x2   :  { %14 = vsyncpa [#allocation9], 0 }
   0x3   :  { %15 = vsyncpa [#allocation4], 0  ;;  %s645_s24 = smov [#allocation5]  }
   0x4   :  { %s31_s25 = sshll.u32 %s645_s24, 4  ;;  %s32_s25 = int_to_ptr.vmem [resolvable:$true] %s31_s25 }
   0x5   :  { %s545_s26 = scalar_lea.vmem %s32_s25, 512  ;;  %p550_p1 = scmp.lt.s32.totalorder %s32_s25, %s32_s25 }
   0x6   :  { %p546_p0 = scmp.ne.s32.totalorder %s32_s25, %s545_s26  ;;  %p551_p2 = scmp.lt.s32.totalorder %s545_s26, %s545_s26 }
   0x8   :  { %p552_p3 = por %p551_p2, %p550_p1 }
   0xa   :  { %p553_p4 = pnand %p552_p3, %p546_p0 }
   0xc   :  { %556 = shalt.err (!%p553_p4)
}
   0xd   :  { %s646_s27 = smov 64   ;;  %s647_s28 = smov 4  }
   0xe   :  { %37 = dma.hbm_to_vmem [thread:$0]  %s754_s1, 512, %s32_s25, [#allocation6], %s646_s27, %s646_s27, %s647_s28  }
   0xf   :  { %s648_s8 = smov [#allocation2]   ;;  %s649_s10 = smov [#allocation7]  }
  0x10   :  { %s22_s9 = sshll.u32 %s648_s8, 4  ;;  %s45_s11 = sshll.u32 %s649_s10, 4  ;;  %s23_s9 = int_to_ptr.vmem [resolvable:$true] %s22_s9  ;;  %s46_s11 = int_to_ptr.vmem [resolvable:$true] %s45_s11 }
  0x11   :  { %s565_s12 = scalar_lea.vmem %s23_s9, 64  ;;  %p570_p6 = scmp.lt.s32.totalorder %s23_s9, %s23_s9 }
  0x12   :  { %p566_p5 = scmp.ne.s32.totalorder %s23_s9, %s565_s12  ;;  %p571_p7 = scmp.lt.s32.totalorder %s565_s12, %s565_s12 }
  0x14   :  { %p572_p8 = por %p571_p7, %p570_p6 }
  0x16   :  { %p573_p9 = pnand %p572_p8, %p566_p5 }
  0x18   :  { %576 = shalt.err (!%p573_p9)
}
  0x19   :  { %25 = dma.hbm_to_vmem [thread:$0]  %s753_s0, 64, %s23_s9, [#allocation3]  }
  0x1a   :  { %s585_s15 = scalar_lea.vmem %s46_s11, 1024  ;;  %p590_p11 = scmp.lt.s32.totalorder %s46_s11, %s46_s11 }
  0x1b   :  { %p586_p10 = scmp.ne.s32.totalorder %s46_s11, %s585_s15  ;;  %p591_p12 = scmp.lt.s32.totalorder %s585_s15, %s585_s15 }
  0x1d   :  { %p592_p13 = por %p591_p12, %p590_p11 }
  0x1f   :  { %p593_p0 = pnand %p592_p13, %p586_p10 }
  0x21   :  { %596 = shalt.err (!%p593_p0)
}
  0x22   :  { %51 = dma.hbm_to_vmem [thread:$0]  %s756_s3, 1024, %s46_s11, [#allocation6], %s646_s27, %s646_s27, %s647_s28  }
  0x23   :  { %s650_s17 = smov [#allocation8]  }
  0x24   :  { %s59_s18 = sshll.u32 %s650_s17, 4  ;;  %s60_s18 = int_to_ptr.vmem [resolvable:$true] %s59_s18 }
  0x25   :  { %s605_s19 = scalar_lea.vmem %s60_s18, 1024  ;;  %p610_p2 = scmp.lt.s32.totalorder %s60_s18, %s60_s18 }
  0x26   :  { %p606_p1 = scmp.ne.s32.totalorder %s60_s18, %s605_s19  ;;  %p611_p3 = scmp.lt.s32.totalorder %s605_s19, %s605_s19 }
  0x28   :  { %p612_p4 = por %p611_p3, %p610_p2 }
  0x2a   :  { %p613_p5 = pnand %p612_p4, %p606_p1 }
  0x2c   :  { %616 = shalt.err (!%p613_p5)
}
  0x2d   :  { %65 = dma.hbm_to_vmem [thread:$0]  %s758_s5, 1024, %s60_s18, [#allocation9], %s646_s27, %s646_s27, %s647_s28  }
  0x2e   :  { %637 = dma.done.wait [#allocation3], 64  }
  0x2f   :  { %638 = vsyncadd [#allocation3], 4294967232 }
  0x30   :  { %639 = dma.done.wait [#allocation6], 1536  }
  0x31   :  { %640 = vsyncadd [#allocation6], 4294965760 }
  0x32   :  { %641 = dma.done.wait [#allocation9], 1024  }
  0x33   :  { %642 = vsyncadd [#allocation9], 4294966272  ;;  %v651_v0 = vmov 0.0   ;;  %vm652_vm0 = vmmov 0   ;;  %v517_v1 = vld [vmem:[#allocation5 + $0x18] sm:$0xff]   ;;  %v518_v2 = vld [vmem:[#allocation5 + $0x10] sm:$0xff]  }
  0x34   :  { %456 = vmatprep.subr.bf16.mxu0 %v651_v0  ;;  %464 = vmatprep.mubr.msk.bf16.mxu0 %vm652_vm0, %v651_v0  ;;  %v521_v3 = vld [vmem:[#allocation7 + $0x38] sm:$0xff]   ;;  %v519_v4 = vld [vmem:[#allocation5 + $0x8] sm:$0xff]   ;;  %v522_v5 = vld [vmem:[#allocation7 + $0x30] sm:$0xff]   ;;  %vm121_vm1 = vcmask 523264   ;;  %s653_s24 = smov [#allocation10]  }
  0x35   :  { %468 = vmatprep.subr.bf16.mxu1 %v651_v0  ;;  %484 = vmatprep.mubr.msk.bf16.mxu1 %vm652_vm0, %v651_v0  ;;  %v520_v6 = vld [vmem:[#allocation5] sm:$0xff]   ;;  %v523_v7 = vld [vmem:[#allocation7 + $0x28] sm:$0xff]   ;;  %v81_v8 = vld [vmem:[#allocation2] sm:$0xf]  ;;  %s398_s25 = sshll.u32 %s653_s24, 4  ;;  %s399_s25 = int_to_ptr.vmem [resolvable:$true] %s398_s25 }
  0x36   :  { %457 = vmatpush3.bf16.msra.mxu0 %v517_v1  ;;  %469 = vmatpush3.bf16.msra.mxu1 %v521_v3  ;;  %v524_v9 = vld [vmem:[#allocation7 + $0x20] sm:$0xff]   ;;  %v525_v10 = vld [vmem:[#allocation7 + $0x18] sm:$0xff]   ;;  %v526_v11 = vld [vmem:[#allocation7 + $0x10] sm:$0xff]   ;;  %p622_p7 = scmp.lt.s32.totalorder %s399_s25, %s399_s25 }
  0x37   :  { %458 = vmatprep.subr.bf16.mxu0 %v651_v0  ;;  %470 = vmatprep.subr.bf16.mxu1 %v651_v0  ;;  %v527_v12 = vld [vmem:[#allocation7 + $0x8] sm:$0xff]   ;;  %v528_v13 = vld [vmem:[#allocation7] sm:$0xff]   ;;  %v529_v14 = vld [vmem:[#allocation8 + $0x38] sm:$0xff]  }
  0x38   :  { %v530_v15 = vld [vmem:[#allocation8 + $0x30] sm:$0xff]   ;;  %v531_v16 = vld [vmem:[#allocation8 + $0x28] sm:$0xff]   ;;  %v532_v17 = vld [vmem:[#allocation8 + $0x20] sm:$0xff]  }
  0x39   :  { %v533_v18 = vld [vmem:[#allocation8 + $0x18] sm:$0xff]   ;;  %v534_v19 = vld [vmem:[#allocation8 + $0x10] sm:$0xff]   ;;  %v535_v28 = vld [vmem:[#allocation8 + $0x8] sm:$0xff]  }
  0x3a   :  { %459 = vmatpush3.bf16.msra.mxu0 %v518_v2  ;;  %471 = vmatpush3.bf16.msra.mxu1 %v522_v5  ;;  %v409_v20 = vld [vmem:[%s755_s2] ss:$0 sm:$0xff]  ;;  %v536_v29 = vld [vmem:[#allocation8] sm:$0xff]  }
  0x3b   :  { %460 = vmatprep.subr.bf16.mxu0 %v651_v0  ;;  %472 = vmatprep.subr.bf16.mxu1 %v651_v0  ;;  %v415_v30 = vld [vmem:[%s757_s4] ss:$0 sm:$0xff]  ;;  %s617_s4 = scalar_lea.vmem %s399_s25, 128 }
  0x3c   :  { %v424_v38 = vld [vmem:[%s759_s6] ss:$0 sm:$0xff]  ;;  %p618_p6 = scmp.ne.s32.totalorder %s399_s25, %s617_s4  ;;  %p623_p8 = scmp.lt.s32.totalorder %s617_s4, %s617_s4 }
  0x3e   :  { %461 = vmatpush3.bf16.msra.mxu0 %v519_v4  ;;  %473 = vmatpush3.bf16.msra.mxu1 %v523_v7  ;;  %p624_p9 = por %p623_p8, %p622_p7 }
  0x3f   :  { %462 = vmatprep.subr.bf16.mxu0 %v651_v0  ;;  %474 = vmatprep.subr.bf16.mxu1 %v651_v0 }
  0x40   :  { %p625_p10 = pnand %p624_p9, %p618_p6 }
  0x42   :  { %463 = vmatpush3.bf16.msra.mxu0 %v520_v6  ;;  %475 = vmatpush3.bf16.msra.mxu1 %v524_v9 }
  0x43   :  { %488 = vmatprep.subr.bf16.mxu0 %v651_v0  ;;  %476 = vmatprep.subr.bf16.mxu1 %v651_v0 }
  0x45   :  { %465 = vmatmul.mubr.msk.bf16.vlgmr.msra.gmra.mxu0 %vm121_vm1, %v81_v8 }
  0x46   :  { %504 = vmatprep.mubr.msk.bf16.mxu0 %vm652_vm0, %v651_v0  ;;  %477 = vmatpush3.bf16.msra.mxu1 %v525_v10 }
  0x47   :  { %478 = vmatprep.subr.bf16.mxu1 %v651_v0  ;;  %489 = vmatpush3.bf16.msra.mxu0 %v529_v14 }
  0x48   :  { %490 = vmatprep.subr.bf16.mxu0 %v651_v0 }
  0x4a   :  { %479 = vmatpush3.bf16.msra.mxu1 %v526_v11 }
  0x4b   :  { %480 = vmatprep.subr.bf16.mxu1 %v651_v0  ;;  %491 = vmatpush3.bf16.msra.mxu0 %v530_v15 }
  0x4c   :  { %492 = vmatprep.subr.bf16.mxu0 %v651_v0 }
  0x4e   :  { %481 = vmatpush3.bf16.msra.mxu1 %v527_v12 }
  0x4f   :  { %482 = vmatprep.subr.bf16.mxu1 %v651_v0  ;;  %493 = vmatpush3.bf16.msra.mxu0 %v531_v16 }
  0x50   :  { %494 = vmatprep.subr.bf16.mxu0 %v651_v0 }
  0x52   :  { %483 = vmatpush3.bf16.msra.mxu1 %v528_v13 }
  0x53   :  { %495 = vmatpush3.bf16.msra.mxu0 %v532_v17 }
  0x54   :  { %496 = vmatprep.subr.bf16.mxu0 %v651_v0 }
  0x57   :  { %497 = vmatpush3.bf16.msra.mxu0 %v533_v18 }
  0x58   :  { %498 = vmatprep.subr.bf16.mxu0 %v651_v0 }
  0x5b   :  { %499 = vmatpush3.bf16.msra.mxu0 %v534_v19 }
  0x5c   :  { %500 = vmatprep.subr.bf16.mxu0 %v651_v0 }
  0x5f   :  { %501 = vmatpush3.bf16.msra.mxu0 %v535_v28 }
  0x60   :  { %502 = vmatprep.subr.bf16.mxu0 %v651_v0 }
  0x63   :  { %503 = vmatpush3.bf16.msra.mxu0 %v536_v29 }
 0x105   :  { %v159_v21 = vpop.f32.mrf.mxu0 }
 0x106   :  { %v160_v22 = vadd.f32 %v409_v20, %v159_v21 }
 0x107   :  { %v466_v23 = vpop.f32.mrf.mxu0 }
 0x108   :  { %v165_v24 = vmax.f32 %v160_v22, 0.0 }
 0x109   :  { %v162_v25 = vpop.f32.mrf.mxu0 }
 0x10a   :  { %v166_v26 = vpack.c.bf16 %v165_v24, %v165_v24 }
 0x10b   :  { %v467_v27 = vpop.f32.mrf.mxu0 }
 0x10c   :  { %485 = vmatmul.mubr.bf16.vlgmr.msra.gmra.mxu1 %v166_v26 }
 0x1cc   :  { %v272_v31 = vpop.f32.mrf.mxu1 }
 0x1cd   :  { %v273_v32 = vadd.f32 %v415_v30, %v272_v31 }
 0x1ce   :  { %v486_v33 = vpop.f32.mrf.mxu1 }
 0x1cf   :  { %v278_v34 = vmax.f32 %v273_v32, 0.0 }
 0x1d0   :  { %v275_v35 = vpop.f32.mrf.mxu1 }
 0x1d1   :  { %v279_v36 = vpack.c.bf16 %v278_v34, %v278_v34 }
 0x1d2   :  { %v487_v37 = vpop.f32.mrf.mxu1 }
 0x1d3   :  { %505 = vmatmul.mubr.bf16.vlgmr.msra.gmra.mxu0 %v279_v36 }
 0x293   :  { %v385_v39 = vpop.f32.mrf.mxu0 }
 0x294   :  { %v386_v40 = vadd.f32 %v424_v38, %v385_v39 }
 0x295   :  { %v506_v41 = vpop.f32.mrf.mxu0 }
 0x296   :  { %391 = vst [vmem:[#allocation10] sm:$0xff] %v386_v40 }
 0x297   :  { %v388_v42 = vpop.f32.mrf.mxu0 }
 0x298   :  { %628 = shalt.err (!%p625_p10)
}
 0x299   :  { %401 = dma.vmem_to_hbm [thread:$0]  %s399_s25, 128, %s760_s7, [#allocation4]   ;;  %v507_v43 = vpop.f32.mrf.mxu0 }
 0x29a   :  { %643 = dma.done.wait [#allocation4], 128  }
 0x29b   :  { %644 = vsyncadd [#allocation4], 4294967168 }
 0x29c   :  { %405 = vsyncpa [#allocation3], 1 }
 0x29d   :  { %406 = vsyncpa [#allocation6], 1 }
 0x29e   :  { %407 = vsyncpa [#allocation9], 1 }
 0x29f   :  { %408 = vsyncpa [#allocation4], 1 }

</bundles_post_ra>
